<compile_context>
chip_gen: v6e
topology: v6e:2x2x1
jax: 0.10.0
libtpu: 0.0.40
codegen_flags: <defaults>
</compile_context>

<pallas_src>
import functools

import jax
import jax.numpy as jnp
from jax.experimental import pallas as pl
from jax.experimental.pallas import tpu as pltpu


# --------------------------------------------------------------------------- #
# Kernels
# --------------------------------------------------------------------------- #
def _wrapped_sq(x_ref, d_ref, bounds):
    """Elementwise pbc(x - d)**2 for the current tile.

    m = |v| - b * floor(|v|/b + 0.5) equals +/- torch's pbc(v) bitwise (the sign is
    irrelevant because the result is squared), dropping the compare/select/ceil chain
    of the literal formulation. The true divide keeps the wrap count bit-identical to
    torch's `v / bounds` at half-period boundaries.
    """
    v = x_ref[...] - d_ref[...]
    if bounds is None:
        return v * v
    b = jnp.float32(bounds)
    a = jnp.abs(v)
    m = a - b * jnp.floor(a / b + jnp.float32(0.5))
    return m * m


def _quadratic_kernel_single(x_ref, d_ref, o_ref, *, bounds):
    """Whole D fits in one tile: direct cross-sublane reduce and lane-dense store."""
    sq = _wrapped_sq(x_ref, d_ref, bounds)
    o_ref[...] = jnp.sum(sq, axis=0, keepdims=True)


def _quadratic_kernel_acc(x_ref, d_ref, o_ref, acc_ref, *, bounds):
    """D tiled across grid axis 1: accumulate into an (8, TN) VMEM scratch with plain
    VPU adds; do the single XLU sublane-reduce only on the last D step."""
    k = pl.program_id(1)

    @pl.when(k == 0)
    def _():
        acc_ref[...] = jnp.zeros_like(acc_ref)

    sq = _wrapped_sq(x_ref, d_ref, bounds)
    td, tn = sq.shape
    acc_ref[...] += jnp.sum(sq.reshape(td // 8, 8, tn), axis=0)

    @pl.when(k == pl.num_programs(1) - 1)
    def _():
        o_ref[...] = jnp.sum(acc_ref[...], axis=0, keepdims=True)


# --------------------------------------------------------------------------- #
# Tiling / budget helpers
# --------------------------------------------------------------------------- #
def _divisors(n):
    ds = set()
    i = 1
    while i * i <= n:
        if n % i == 0:
            ds.add(i)
            ds.add(n // i)
        i += 1
    return ds


def _vmem_capacity_bytes():
    try:
        cap = int(getattr(pltpu.get_tpu_info(), "vmem_capacity_bytes", 0))
        if cap > 0:
            return cap
    except Exception:
        pass
    return 64 << 20  # conservative default: v7x per-TensorCore VMEM


def _default_budgets():
    """(double-buffered-input byte budget, vmem_limit_bytes), generation-aware."""
    cap = _vmem_capacity_bytes()
    if cap >= (100 << 20):          # v5e / v6e: 128 MiB physical VMEM
        return 40 << 20, 96 << 20
    return 24 << 20, 48 << 20       # v7x (64 MiB per TensorCore) or unknown


def _pick_tiles(D, N, per_tile_bytes):
    """Pick (td, tn) for a (D, N) fp32 input tile of at most per_tile_bytes bytes.

    Lane tile first (as wide as the budget allows, >= 2 N-tiles when possible so both
    v7x TensorCores get work), then shrink the sublane tile to fit the budget.
    """
    max_elems = max(per_tile_bytes // 4, 8 * 128)
    min_td = 8 if (D % 8 == 0 and D > 8) else D

    tn_cap = max(max_elems // max(min_td, 1), 128)
    if N >= 256:
        tn_cap = min(tn_cap, N // 2)      # keep >= 2 steps on the parallel N axis
    tn = 128
    for cand in sorted((128 * d for d in _divisors(N // 128)), reverse=True):
        if cand <= tn_cap:
            tn = cand
            break

    td_cap = max(max_elems // tn, 1)
    if D <= td_cap or D % 8 != 0:
        td = D
    else:
        td = 8
        for cand in sorted((8 * d for d in _divisors(D // 8)), reverse=True):
            if cand <= td_cap:
                td = cand
                break
    return td, tn


# --------------------------------------------------------------------------- #
# Forward wrapper
# --------------------------------------------------------------------------- #
def quadratic_forward(weights, data, bounds=None, *, input_vmem_budget_bytes=None):
    """weights, data: (D, N). Returns Z = sum(pbc(weights - data)**2, axis=0), shape (N,)."""
    D, N = weights.shape
    assert data.shape == (D, N)

    w = jnp.asarray(weights, jnp.float32)
    d = jnp.asarray(data, jnp.float32)

    default_budget, vmem_limit = _default_budgets()
    budget = int(input_vmem_budget_bytes or default_budget)
    per_tile = max(budget // 4, 4096)     # 2 inputs x 2 pipeline buffers

    # Pad the lane axis to a multiple of 128; pad the sublane axis to a multiple of 8
    # only if D has to be tiled. Zero padding contributes exactly 0 to Z.
    N_pad = -(-N // 128) * 128
    D_pad = D
    if D % 8 != 0 and D * 128 * 4 > per_tile:
        D_pad = -(-D // 8) * 8
    if (D_pad, N_pad) != (D, N):
        w = jnp.pad(w, ((0, D_pad - D), (0, N_pad - N)))
        d = jnp.pad(d, ((0, D_pad - D), (0, N_pad - N)))

    td, tn = _pick_tiles(D_pad, N_pad, per_tile)
    nj, nk = N_pad // tn, D_pad // td

    if nk > 1:
        kernel = functools.partial(_quadratic_kernel_acc, bounds=bounds)
        scratch_shapes = (pltpu.VMEM((8, tn), jnp.float32),)
    else:
        kernel = functools.partial(_quadratic_kernel_single, bounds=bounds)
        scratch_shapes = ()

    flops_per_elem = 8 if bounds is not None else 3
    cost = pl.CostEstimate(
        flops=flops_per_elem * D_pad * N_pad,
        transcendentals=(D_pad * N_pad) if bounds is not None else 0,
        bytes_accessed=(2 * D_pad * N_pad + N_pad) * 4,
    )

    out = pl.pallas_call(
        kernel,
        out_shape=jax.ShapeDtypeStruct((1, N_pad), jnp.float32),
        grid=(nj, nk),                                     # reduction (D) axis last
        in_specs=[
            pl.BlockSpec((td, tn), lambda j, k: (k, j)),
            pl.BlockSpec((td, tn), lambda j, k: (k, j)),
        ],
        # Same output block for every D step -> VMEM-resident, lane-dense accumulator.
        out_specs=pl.BlockSpec((1, tn), lambda j, k: (0, j)),
        scratch_shapes=scratch_shapes,
        compiler_params=pltpu.CompilerParams(
            dimension_semantics=("parallel", "arbitrary"),
            vmem_limit_bytes=int(vmem_limit),
        ),
        cost_estimate=cost,
    )(w, d)

    z = out[0]
    return z[:N] if N_pad != N else z


def reference_forward(weights, data, bounds=None):
    """Pure-JAX reference with literal torch pbc semantics."""
    v = weights - data
    if bounds is not None:
        b = jnp.float32(bounds)
        pos = v - b * jnp.floor(v / b + 0.5)
        neg = v - b * jnp.ceil(v / b - 0.5)
        v = jnp.where(v >= 0, pos, neg)
    return jnp.sum(v * v, axis=0)


if __name__ == "__main__":
    key = jax.random.PRNGKey(0)
    k1, k2, k3, k4 = jax.random.split(key, 4)

    # Case 1: aligned shapes, periodic bounds (single-D-step kernel path).
    D, N, bounds = 8, 512, 2.5
    w = jax.random.uniform(k1, (D, N), jnp.float32, minval=-4.0, maxval=4.0)
    d = jax.random.uniform(k2, (D, N), jnp.float32, minval=-4.0, maxval=4.0)
    z = quadratic_forward(w, d, bounds=bounds)
    jax.block_until_ready(z)
    assert z.shape == (N,)
    assert jnp.allclose(z, reference_forward(w, d, bounds), atol=1e-5, rtol=1e-5)

    # Case 2: no bounds (pure quadratic).
    z2 = quadratic_forward(w, d, bounds=None)
    jax.block_until_ready(z2)
    assert jnp.allclose(z2, reference_forward(w, d, None), atol=1e-5, rtol=1e-5)

    # Case 3: unaligned N (lane-padding path) and D not a multiple of 8.
    D3, N3, b3 = 12, 200, 1.75
    w3 = jax.random.uniform(k3, (D3, N3), jnp.float32, minval=-3.0, maxval=3.0)
    d3 = jax.random.uniform(k4, (D3, N3), jnp.float32, minval=-3.0, maxval=3.0)
    z3 = quadratic_forward(w3, d3, bounds=b3)
    jax.block_until_ready(z3)
    assert z3.shape == (N3,)
    assert jnp.allclose(z3, reference_forward(w3, d3, b3), atol=1e-5, rtol=1e-5)

    # Case 4: tiny VMEM budget override to force D tiling (accumulator kernel path).
    D4, N4 = 32, 512
    w4 = jax.random.uniform(k1, (D4, N4), jnp.float32, minval=-4.0, maxval=4.0)
    d4 = jax.random.uniform(k2, (D4, N4), jnp.float32, minval=-4.0, maxval=4.0)
    z4 = quadratic_forward(w4, d4, bounds=2.5, input_vmem_budget_bytes=64 << 10)
    jax.block_until_ready(z4)
    assert jnp.allclose(z4, reference_forward(w4, d4, 2.5), atol=1e-5, rtol=1e-5)

    print("KERNEL_OK")
</pallas_src>

<mosaic_0001>
module attributes {stable_mosaic.version = 11 : i64} {
  func.func @_quadratic_kernel_single(%arg0: i32, %arg1: i32, %arg2: memref<8x256xf32, #tpu.memory_space<vmem>>, %arg3: memref<8x256xf32, #tpu.memory_space<vmem>>, %arg4: memref<1x256xf32, #tpu.memory_space<vmem>>) attributes {dimension_semantics = [#tpu.dimension_semantics<parallel>, #tpu.dimension_semantics<arbitrary>], iteration_bounds = array<i64: 2, 1>, scalar_prefetch = 0 : i64, scratch_operands = 0 : i64, tpu.core_type = #tpu.core_type<tc>, window_params = [{transform_indices = @transform_0, window_bounds = array<i64: 8, 256>}, {transform_indices = @transform_1, window_bounds = array<i64: 8, 256>}, {transform_indices = @transform_2, window_bounds = array<i64: 1, 256>}]} {
    %c0 = arith.constant 0 : index
    %c0_0 = arith.constant 0 : index
    %0 = vector.load %arg2[%c0, %c0_0] : memref<8x256xf32, #tpu.memory_space<vmem>>, vector<8x256xf32>
    %c0_1 = arith.constant 0 : index
    %c0_2 = arith.constant 0 : index
    %1 = vector.load %arg3[%c0_1, %c0_2] : memref<8x256xf32, #tpu.memory_space<vmem>>, vector<8x256xf32>
    %2 = arith.subf %0, %1 : vector<8x256xf32>
    %3 = math.absf %2 : vector<8x256xf32>
    %cst = arith.constant 2.500000e+00 : f32
    %4 = vector.broadcast %cst : f32 to vector<8x256xf32>
    %5 = arith.divf %3, %4 : vector<8x256xf32>
    %cst_3 = arith.constant 5.000000e-01 : f32
    %6 = vector.broadcast %cst_3 : f32 to vector<8x256xf32>
    %7 = arith.addf %5, %6 : vector<8x256xf32>
    %8 = math.floor %7 : vector<8x256xf32>
    %cst_4 = arith.constant 2.500000e+00 : f32
    %9 = vector.broadcast %cst_4 : f32 to vector<8x256xf32>
    %10 = arith.mulf %9, %8 : vector<8x256xf32>
    %11 = arith.subf %3, %10 : vector<8x256xf32>
    %12 = arith.mulf %11, %11 : vector<8x256xf32>
    %cst_5 = arith.constant dense<0.000000e+00> : vector<256xf32>
    %13 = vector.multi_reduction <add>, %12, %cst_5 [0] : vector<8x256xf32> to vector<256xf32>
    %14 = vector.shape_cast %13 : vector<256xf32> to vector<1x256xf32>
    %c0_6 = arith.constant 0 : index
    %c0_7 = arith.constant 0 : index
    %15 = vector.load %arg4[%c0_6, %c0_7] : memref<1x256xf32, #tpu.memory_space<vmem>>, vector<1x256xf32>
    tpu.vector_store %arg4[%c0_6, %c0_7], %14 {strides = array<i32>} : memref<1x256xf32, #tpu.memory_space<vmem>>, vector<1x256xf32>,
    return
  }
  func.func @transform_0(%arg0: i32, %arg1: i32) -> (i32, i32) {
    %c0_i32 = arith.constant 0 : i32
    return %arg1, %arg0 : i32, i32
  }
  func.func @transform_1(%arg0: i32, %arg1: i32) -> (i32, i32) {
    %c0_i32 = arith.constant 0 : i32
    return %arg1, %arg0 : i32, i32
  }
  func.func @transform_2(%arg0: i32, %arg1: i32) -> (i32, i32) {
    %c0_i32 = arith.constant 0 : i32
    %c0_i32_0 = arith.constant 0 : i32
    return %c0_i32, %arg0 : i32, i32
  }
}

</mosaic_0001>

<bundles_post_ra>
// kernel: tpu_custom_call.1
= control target key start
LH: loop header
LB: loop body
LE: loop exit
PB: predicated region body
PF: predicated region fallthrough
CT: control target
= control target key end

     0   :  { %7 = vsyncpa [#allocation3], 0  ;;  %s809_s0 = inlined_call_operand.hbm [shape: f32[8,512], index: 0, kind: input, shape index: {}]   ;;  %s810_s1 = inlined_call_operand.hbm [shape: f32[8,512], index: 1, kind: input, shape index: {}]   ;;  %s811_s2 = inlined_call_operand.hbm [shape: f32[1,512], index: 2, kind: output, shape index: {}]  }
   0x1   :  { %9 = vsyncpa [#allocation3 + $0x1], 0 }
   0x2   :  { %10 = vsyncpa [#allocation6], 0 }
   0x3   :  { %12 = vsyncpa [#allocation6 + $0x1], 0 }
   0x4   :  { %13 = vsyncpa [#allocation4], 0 }
   0x5   :  { %15 = vsyncpa [#allocation4 + $0x1], 0  ;;  %s647_s9 = smov 0   ;;  %s649_s10 = smov 0  }
   0x6   :  { %s651_s11 = smov 0   ;;  %s653_s12 = smov 0  }
   0x7   :  { %s655_s13 = smov 0   ;;  %s657_s14 = smov 0  }
   0x8 LB: > { %s396_s15 = sadd.s32 4294967295, %s626_s14   ;;  %s397_s16 = sadd.s32 4294967294, %s626_s14   ;;  %s626_s14 = sphi %s657_s14, %s21_s14   ;;  %s622_s13 = sphi %s655_s13, %s823_s13   ;;  %s618_s12 = sphi %s653_s12, %s822_s12   ;;  %s614_s11 = sphi %s651_s11, %s821_s11   ;;  %s610_s10 = sphi %s649_s10, %s820_s10   ;;  %s606_s9 = sphi %s647_s9, %s819_s9  }
   0x9   : > { %s33_s17 = sadd.s32 1, %s622_s13  ;;  %s42_s18 = sadd.s32 1, %s614_s11 }
   0xa   : > { %p35_p0 = scmp.ge.s32.totalorder %s33_s17, 2  ;;  %p49_p1 = scmp.ne.s32.totalorder %s614_s11, %s610_s10 }
   0xb   : > { %p50_p2 = scmp.eq.s32.totalorder %s626_s14, 0  ;;  %p55_p3 = scmp.ne.s32.totalorder %s610_s10, %s606_s9 }
   0xc   : > { %s825_s17 = smov (%p35_p0, %s33_s17), 0  ;;  %p56_p5 = scmp.eq.s32.totalorder %s396_s15, 0 }
   0xd   : > { %p688_p4 = por %p50_p2, %p49_p1  ;;  %s38_s20 = ssub.s32 %s622_s13, %s825_s17 }
   0xe   : > { %p107_p6 = scmp.eq.s32.totalorder %s396_s15, 1  ;;  %p40_p7 = scmp.eq.s32.totalorder %s38_s20, 0 }
   0xf   : > { %p694_p8 = por %p56_p5, %p55_p3  ;;  %p113_p10 = scmp.eq.s32.totalorder %s397_s16, 1 }
  0x10   : > { %p698_p9 = por %p107_p6, %p49_p1  ;;  %p435_p13 = scmp.lt.s32.totalorder %s626_s14, 2 }
  0x11   : > { %s703_s23 = scalar_select %p40_p7, %s614_s11, %s42_s18  }
  0x12   : > { %p705_p11 = por %p113_p10, %p55_p3  ;;  %s712_s25 = sand.u32 1, %s614_s11  }
  0x13   : > { %s400_s26 = sshll.u32 %s712_s25, 4  ;;  %s415_s27 = sshll.u32 %s622_s13, 8 }
  0x14   : > { %s145_s30 = scalar_lea.hbm %s809_s0, %s415_s27  ;;  %s137_s3 = scalar_lea.vmem [#allocation2], %s400_s26 }
  0x15   : > { %s147_s4 = sshll.u32 %s137_s3, 4  ;;  %p721_p0 = pnand %p435_p13, %p688_p4  ;;  %s148_s4 = int_to_ptr.vmem [resolvable:$true] %s147_s4 }
  0x16   : > { %p406_p1 = scmp.ge.s32.totalorder %s626_s14, 1  ;;  %p173_p2 = scmp.lt.s32.totalorder %s626_s14, 3 }
  0x17   : > { %s134_s6 = scalar_lea.sflag [#allocation3], %s712_s25  ;;  %p488_p3 = pneg %p721_p0 }
  0x18   : > { %s499_s7 = scalar_lea.vmem %s148_s4, 256  ;;  %s628_s8 = smov [#allocation2]  }
  0x19   : > { %p500_p5 = scmp.ne.s32.totalorder %s148_s4, %s499_s7  ;;  %s504_s15 = sshll.u32 %s628_s8, 4  ;;  %s505_s15 = int_to_ptr.vmem [resolvable:$false] %s504_s15 }
  0x1a   : > { %s506_s16 = scalar_lea.vmem %s505_s15, 512  ;;  %p507_p4 = scmp.lt.s32.totalorder %s148_s4, %s505_s15 }
  0x1b   : > { %p502_p6 = pnand %p500_p5, %p488_p3  ;;  %p508_p10 = scmp.lt.s32.totalorder %s506_s16, %s499_s7 }
  0x1d   : > { %p503_p7 = pneg %p502_p6  ;;  %p509_p13 = por %p508_p10, %p507_p4 }
  0x1f   : > { %p510_p12 = pnand %p509_p13, %p503_p7 }
  0x21   : > { %513 = shalt.err (!%p510_p12)
}
  0x22   : > { %427 = dma.hbm_to_vmem [thread:$0]  (!%p721_p0), %s145_s30, 256, %s148_s4, %s134_s6  }
  0x23   : > { %p739_p5 = pnand %p406_p1, %p173_p2  ;;  %s166_s28 = scalar_lea.hbm %s810_s1, %s415_s27 }
  0x24   : > { %s158_s29 = scalar_lea.vmem [#allocation5], %s400_s26  ;;  %s155_s7 = scalar_lea.sflag [#allocation6], %s712_s25 }
  0x25   : > { %s168_s3 = sshll.u32 %s158_s29, 4  ;;  %s629_s30 = smov [#allocation5]   ;;  %s169_s3 = int_to_ptr.vmem [resolvable:$true] %s168_s3 }
  0x26   : > { %s527_s8 = scalar_lea.vmem %s169_s3, 256  ;;  %s532_s4 = sshll.u32 %s629_s30, 4  ;;  %s533_s4 = int_to_ptr.vmem [resolvable:$false] %s532_s4 }
  0x27   : > { %p528_p12 = scmp.ne.s32.totalorder %s169_s3, %s527_s8  ;;  %s534_s6 = scalar_lea.vmem %s533_s4, 512 }
  0x28   : > { %p535_p1 = scmp.lt.s32.totalorder %s169_s3, %s533_s4  ;;  %p536_p2 = scmp.lt.s32.totalorder %s534_s6, %s527_s8 }
  0x29   : > { %p530_p6 = pnand %p528_p12, %p488_p3 }
  0x2a   : > { %p537_p4 = por %p536_p2, %p535_p1 }
  0x2b   : > { %p531_p7 = pneg %p530_p6 }
  0x2d   : > { %p538_p10 = pnand %p537_p4, %p531_p7 }
  0x2f   : > { %541 = shalt.err (!%p538_p10)
}
  0x30   : > { %430 = dma.hbm_to_vmem [thread:$0]  (!%p721_p0), %s166_s28, 256, %s169_s3, %s155_s7  }
  0x31   : > { %177 = sbr.rel (%p739_p5) target bundleno = 106 (0x6a), region = 28  ;;  %s755_s25 = sand.u32 (!%p739_p5), 1, %s610_s10  }
  0x32   : > { %s407_s26 = sshll.u32 (!%p739_p5), %s755_s25, 4  ;;  %s180_s27 = scalar_lea.sflag (!%p739_p5), [#allocation3], %s755_s25 }
  0x33   : > { %s183_s15 = scalar_lea.vmem (!%p739_p5), [#allocation2], %s407_s26 }
  0x36   : > { %593 = dma.done.wait (%p694_p8), %s180_s27, 256  }
  0x37   : > { %595 = vsyncadd (%p694_p8), %s180_s27, 4294967040  ;;  %s189_s5 = scalar_lea.sflag [#allocation6], %s755_s25  ;;  %s192_s16 = scalar_lea.vmem [#allocation5], %s407_s26 }
  0x38   : > { %597 = dma.done.wait (%p694_p8), %s189_s5, 256  }
  0x39   : > { %599 = vsyncadd (%p694_p8), %s189_s5, 4294967040  ;;  %v221_v0 = vld [vmem:[%s183_s15] sm:$0xff]  ;;  %v222_v1 = vld [vmem:[%s183_s15 + $0x8] sm:$0xff]  ;;  %v630_v24 = vmov 1966171168   ;;  %v260_v26 = vlaneseq  ;;  %s409_s21 = sshll.u32 %s755_s25, 1 }
  0x3a   : > { %v223_v2 = vld [vmem:[%s192_s16] sm:$0xff]  ;;  %v224_v3 = vld [vmem:[%s192_s16 + $0x8] sm:$0xff]  ;;  %v258_v25 = vunpack.c.l.s4 %v630_v24  ;;  %s217_s18 = scalar_lea.vmem [#allocation7], %s409_s21  ;;  %s417_s20 = sshll.u32 %s618_s12, 5 }
  0x3b   : > { %v225_v4 = vsub.f32 %v221_v0, %v223_v2  ;;  %v226_v5 = vsub.f32 %v222_v1, %v224_v3  ;;  %v261_v32 = vshrl.u32 %v260_v26, 7  ;;  %s292_s19 = sshll.u32 %s217_s18, 4  ;;  %vm274_vm0 = vcmp.lt.s32.totalorder %v260_v26, 256  ;;  %s290_s3 = scalar_lea.hbm %s811_s2, %s417_s20  ;;  %s293_s19 = int_to_ptr.vmem [resolvable:$true] %s292_s19 }
  0x3c   : > { %v259_v31 = vunpack.c.0.s8 %v258_v25  ;;  %s278_s7 = scalar_lea.sflag [#allocation4], %s755_s25  ;;  %s542_s8 = scalar_lea.vmem %s293_s19, 32 }
  0x3d   : > { %v227_v6 = vand.u32 2147483647, %v225_v4  ;;  %v228_v7 = vand.u32 2147483647, %v226_v5  ;;  %p543_p8 = scmp.ne.s32.totalorder %s293_s19, %s542_s8  ;;  %s631_s30 = smov [#allocation7]  }
  0x3e   : > { %v262_v37 = vsub.s32 %v259_v31, %v261_v32  ;;  %s546_s4 = sshll.u32 %s631_s30, 4  ;;  %s547_s4 = int_to_ptr.vmem [resolvable:$false] %s546_s4 }
  0x3f   : > { %v230_v8 = vmul.f32 0.4, %v227_v6  ;;  %v231_v9 = vmul.f32 0.4, %v228_v7  ;;  %p544_p0 = pnand %p543_p8, %p698_p9  ;;  %s548_s6 = scalar_lea.vmem %s547_s4, 64 }
  0x40   : > { %p549_p13 = scmp.lt.s32.totalorder %s293_s19, %s547_s4  ;;  %p550_p5 = scmp.lt.s32.totalorder %s548_s6, %s542_s8 }
  0x41   : > { %v232_v10 = vadd.f32 0.5, %v230_v8  ;;  %v233_v11 = vadd.f32 0.5, %v231_v9  ;;  %p545_p3 = pneg %p544_p0 }
  0x42   : > { %p551_p12 = por %p550_p5, %p549_p13 }
  0x43   : > { %v234_v12 = vfloor.f32 %v232_v10  ;;  %v235_v13 = vfloor.f32 %v233_v11 }
  0x44   : > { %p552_p6 = pnand %p551_p12, %p545_p3 }
  0x45   : > { %v236_v14 = vmul.f32 2.5, %v234_v12  ;;  %v237_v15 = vmul.f32 2.5, %v235_v13 }
  0x47   : > { %v238_v16 = vsub.f32 %v227_v6, %v236_v14  ;;  %v239_v17 = vsub.f32 %v228_v7, %v237_v15 }
  0x49   : > { %v240_v18 = vmul.f32 %v238_v16, %v238_v16  ;;  %v241_v19 = vmul.f32 %v239_v17, %v239_v17 }
  0x4b   : > { %v242_v20 = vrot.slane %v240_v18, 4  ;;  %v248_v21 = vrot.slane %v241_v19, 4 }
  0x4d   : > { %v243_v22 = vadd.f32 %v242_v20, %v240_v18  ;;  %v249_v23 = vadd.f32 %v248_v21, %v241_v19 }
  0x4f   : > { %v244_v27 = vrot.slane %v243_v22, 2  ;;  %v250_v28 = vrot.slane %v249_v23, 2 }
  0x51   : > { %v245_v29 = vadd.f32 %v244_v27, %v243_v22  ;;  %v251_v30 = vadd.f32 %v250_v28, %v249_v23 }
  0x53   : > { %v246_v33 = vrot.slane %v245_v29, 1  ;;  %v252_v34 = vrot.slane %v251_v30, 1 }
  0x55   : > { %v247_v35 = vadd.f32 %v246_v33, %v245_v29  ;;  %v253_v36 = vadd.f32 %v252_v34, %v251_v30 }
  0x57   : > { %v256_v38 = vcombine.low %v247_v35, %v253_v36 }
  0x59   : > { %v263_v39 = vrot.slane %v256_v38, %v262_v37 }
  0x5b   : > { %v270_v40 = vrot.slane %v263_v39, %v262_v37 }
  0x5d   : > { %276 = vst.msk [vmem:[%s217_s18] sm:$0x3] %vm274_vm0, %v270_v40 }
  0x5e   : > { %555 = shalt.err (!%p552_p6)
}
  0x5f   : > { %s556_s12 = scalar_lea.hbm %s290_s3, 32  ;;  %s560_s27 = scalar_lea.hbm %s811_s2, 64 }
  0x60   : > { %p557_p7 = scmp.ne.s32.totalorder %s290_s3, %s556_s12  ;;  %p561_p4 = scmp.lt.s32.totalorder %s290_s3, %s811_s2 }
  0x61   : > { %p562_p10 = scmp.lt.s32.totalorder %s560_s27, %s556_s12 }
  0x62   : > { %p558_p1 = pnand %p557_p7, %p698_p9 }
  0x63   : > { %p563_p8 = por %p562_p10, %p561_p4 }
  0x64   : > { %p559_p2 = pneg %p558_p1 }
  0x66   : > { %p564_p0 = pnand %p563_p8, %p559_p2 }
  0x68   : > { %567 = shalt.err (!%p564_p0)
}
  0x69   : > { %422 = dma.vmem_to_hbm [thread:$0]  (%p698_p9), %s293_s19, 32, %s290_s3, %s278_s7  }
  0x6a PF: > { %s304_s16 = sand.u32 1, %s606_s9   ;;  %p818_p3 = scmp.ge.s32.totalorder %s626_s14, 2 }
  0x6b   : > { %s305_s21 = scalar_lea.sflag [#allocation4], %s304_s16 }
  0x6c   : > { %p432_p13 = pnand %p818_p3, %p705_p11 }
  0x6e   : > { %p433_p5 = pneg %p432_p13 }
  0x70   : > { %601 = dma.done.wait (%p433_p5), %s305_s21, 32  }
  0x71   : > { %603 = vsyncadd (%p433_p5), %s305_s21, 4294967264  ;;  %s21_s14 = sadd.s32 1, %s626_s14   ;;  %s819_s9 = smov %s610_s10 }
  0x72   : > { %p18_p12 = scmp.ge.s32.totalorder %s21_s14, 4   ;;  %s820_s10 = smov %s614_s11 }
  0x73   : > { %s821_s11 = smov %s703_s23  ;;  %s822_s12 = smov %s622_s13 }
  0x74   : > { %s823_s13 = smov %s825_s17  ;;  %20 = sbr.rel (!%p18_p12) target bundleno = 8 (0x8), region = 86 }
  0x79   :  { %310 = vsyncpa [#allocation3], 1 }
  0x7a   :  { %312 = vsyncpa [#allocation3 + $0x1], 1 }
  0x7b   :  { %313 = vsyncpa [#allocation6], 1 }
  0x7c   :  { %315 = vsyncpa [#allocation6 + $0x1], 1 }
  0x7d   :  { %316 = vsyncpa [#allocation4], 1 }
  0x7e   :  { %318 = vsyncpa [#allocation4 + $0x1], 1 }

</bundles_post_ra>
